<compile_context>
chip_gen: v7x
topology: tpu7x:2x2x1
jax: 0.10.0
libtpu: 0.0.40
codegen_flags: <defaults>
</compile_context>

<pallas_src>
import functools

import jax
import jax.numpy as jnp
import numpy as np
from jax.experimental import pallas as pl
from jax.experimental.pallas import tpu as pltpu

MAX_LENGTH = 10
LANE = 128

# Column-block layout of the packed weight/bias slab (each block is 128 lanes,
# weights at rows [0:H], everything else zero):
#   0: W_attn[0:H]   (+b_attn)   3: W_hh_r (+b)   6: W_comb[H:2H]  9:  W_ih_n (+b)
#   1: W_comb[0:H]   (+b_comb)   4: W_hh_z (+b)   7: W_ih_r (+b)   10: W_out  (+b_out)
#   2: W_attn[H:2H]              5: W_hh_n (+b)   8: W_ih_z (+b)
N_BLOCKS = 11


# --------------------------------------------------------------------------- #
# Kernel: one decode step per grid iteration, hidden carried in VMEM scratch.
# --------------------------------------------------------------------------- #
def attn_decoder_kernel(emb_ref, h0_ref, enc_ref, w_ref, b_ref, out_ref, h_ref,
                        *, V, L):
    t = pl.program_id(0)

    @pl.when(t == 0)
    def _():
        h_ref[...] = h0_ref[...]            # (1,128) f32, h at lanes [0:H], pads 0

    cdt = w_ref.dtype                       # bf16 (or f32) MXU operand dtype
    lane = jax.lax.broadcasted_iota(jnp.int32, (1, LANE), 1)

    emb = emb_ref[...]                      # (1,128) cdt, emb at lanes [0:H]
    hid = h_ref[...]                        # (1,128) f32, hid at lanes [0:H]

    # --- dot E: emb-side -> [attn_logits_emb | pre_comb]  (cols 0:256) -------
    res_e = jnp.dot(emb, w_ref[:, 0:2 * LANE],
                    preferred_element_type=jnp.float32) + b_ref[:, 0:2 * LANE]
    # --- dot H: hid-side -> [attn_logits_hid | gh_r | gh_z | gh_n] (256:768) -
    res_h = jnp.dot(hid.astype(cdt), w_ref[:, 2 * LANE:6 * LANE],
                    preferred_element_type=jnp.float32) + b_ref[:, 2 * LANE:6 * LANE]

    attn_logits = res_e[:, 0:LANE] + res_h[:, 0:LANE]      # valid lanes [0:L]
    pre_comb = res_e[:, LANE:2 * LANE]                     # emb @ W_comb[:H] + b_comb
    gh_r = res_h[:, LANE:2 * LANE]
    gh_z = res_h[:, 2 * LANE:3 * LANE]
    gh_n = res_h[:, 3 * LANE:4 * LANE]

    # attn_weights = softmax over the first L lanes (pad lanes -> -inf) -------
    logits = jnp.where(lane < L, attn_logits, -jnp.inf)
    m = jnp.max(logits, axis=-1, keepdims=True)
    e = jnp.exp(logits - m)
    attn_w = e * pl.reciprocal(jnp.sum(e, axis=-1, keepdims=True), approx=False)

    # attn_applied = attn_w @ encoder_outputs (rows/cols zero-padded to 128) --
    attn_applied = jnp.dot(attn_w.astype(cdt), enc_ref[...],
                           preferred_element_type=jnp.float32)   # valid [0:H]

    # attn_combine(cat(emb, attn_applied)) + relu, without the lane concat ----
    comb_a = jnp.dot(attn_applied.astype(cdt), w_ref[:, 6 * LANE:7 * LANE],
                     preferred_element_type=jnp.float32)
    x = jnp.maximum(pre_comb + comb_a, 0.0)                      # valid [0:H], pads 0

    # input-side GRU gates: one fused push over 3 aligned gate blocks ---------
    gi = jnp.dot(x.astype(cdt), w_ref[:, 7 * LANE:10 * LANE],
                 preferred_element_type=jnp.float32) + b_ref[:, 7 * LANE:10 * LANE]
    gi_r = gi[:, 0:LANE]
    gi_z = gi[:, LANE:2 * LANE]
    gi_n = gi[:, 2 * LANE:3 * LANE]

    # PyTorch GRU gate conventions (r|z|n), f32 VPU/EUP math ------------------
    r = jax.nn.sigmoid(gi_r + gh_r)
    z = jax.nn.sigmoid(gi_z + gh_z)
    n = jnp.tanh(gi_n + r * gh_n)
    h_new = (1.0 - z) * n + z * hid          # valid [0:H], pad lanes stay 0

    h_ref[...] = h_new                       # carry to next step (VMEM resident)

    # out(h_new) -> log_softmax over the first V lanes ------------------------
    out_logits = jnp.dot(h_new.astype(cdt), w_ref[:, 10 * LANE:11 * LANE],
                         preferred_element_type=jnp.float32) + b_ref[:, 10 * LANE:11 * LANE]
    ol = jnp.where(lane < V, out_logits, -jnp.inf)
    lm = jnp.max(ol, axis=-1, keepdims=True)
    lse = lm + jnp.log(jnp.sum(jnp.exp(ol - lm), axis=-1, keepdims=True))
    logp = jnp.where(lane < V, ol - lse, 0.0)

    # Single lane-packed (1,384) output block: three aligned unmasked stores.
    out_ref[:, 0:LANE] = logp
    out_ref[:, LANE:2 * LANE] = h_new
    out_ref[:, 2 * LANE:3 * LANE] = attn_w


# --------------------------------------------------------------------------- #
# Parameters (same math as nn.Linear / nn.GRU, stored as (in, out))
# --------------------------------------------------------------------------- #
def init_params(key, hidden_size, output_size, max_length):
    H, V, L = hidden_size, output_size, max_length
    ks = jax.random.split(key, 6)

    def lin(k, fan_in, fan_out):
        k1, k2 = jax.random.split(k)
        bound = 1.0 / float(np.sqrt(fan_in))
        w = jax.random.uniform(k1, (fan_in, fan_out), jnp.float32, -bound, bound)
        b = jax.random.uniform(k2, (fan_out,), jnp.float32, -bound, bound)
        return w, b

    embedding = jax.random.normal(ks[0], (V, H), jnp.float32)
    w_attn, b_attn = lin(ks[1], 2 * H, L)      # nn.Linear(2H, max_length)
    w_comb, b_comb = lin(ks[2], 2 * H, H)      # nn.Linear(2H, H)
    w_ih, b_ih = lin(ks[3], H, 3 * H)          # GRU weight_ih_l0 (gates r|z|n)
    w_hh, b_hh = lin(ks[4], H, 3 * H)          # GRU weight_hh_l0 (gates r|z|n)
    w_out, b_out = lin(ks[5], H, V)            # nn.Linear(H, V)

    return dict(
        hidden_size=H, output_size=V, max_length=L, embedding=embedding,
        w_attn=w_attn, b_attn=b_attn, w_comb=w_comb, b_comb=b_comb,
        w_ih=w_ih, b_ih=b_ih, w_hh=w_hh, b_hh=b_hh, w_out=w_out, b_out=b_out,
    )


def pack_params(params, weight_dtype=jnp.bfloat16):
    """Pack all weights into one 128-row slab of 128-lane column blocks."""
    H, V, L = params["hidden_size"], params["output_size"], params["max_length"]
    assert H <= LANE and V <= LANE and L <= LANE, "layout assumes H,V,L <= 128"

    width = N_BLOCKS * LANE
    w_np = np.zeros((LANE, width), np.float32)
    b_np = np.zeros((1, width), np.float32)

    def put(blk, w, b=None):
        c = blk * LANE
        w = np.asarray(w, np.float32)
        w_np[: w.shape[0], c: c + w.shape[1]] = w
        if b is not None:
            b = np.asarray(b, np.float32)
            b_np[0, c: c + b.shape[0]] = b

    w_attn = np.asarray(params["w_attn"], np.float32)
    w_comb = np.asarray(params["w_comb"], np.float32)
    w_ih = np.asarray(params["w_ih"], np.float32)
    w_hh = np.asarray(params["w_hh"], np.float32)

    put(0, w_attn[0:H], params["b_attn"])          # attn, emb rows (+bias)
    put(1, w_comb[0:H], params["b_comb"])          # attn_combine, emb rows (+bias)
    put(2, w_attn[H:2 * H])                        # attn, hidden rows
    put(3, w_hh[:, 0:H], np.asarray(params["b_hh"])[0:H])          # hh gate r
    put(4, w_hh[:, H:2 * H], np.asarray(params["b_hh"])[H:2 * H])  # hh gate z
    put(5, w_hh[:, 2 * H:3 * H], np.asarray(params["b_hh"])[2 * H:])  # hh gate n
    put(6, w_comb[H:2 * H])                        # attn_combine, attn_applied rows
    put(7, w_ih[:, 0:H], np.asarray(params["b_ih"])[0:H])          # ih gate r
    put(8, w_ih[:, H:2 * H], np.asarray(params["b_ih"])[H:2 * H])  # ih gate z
    put(9, w_ih[:, 2 * H:3 * H], np.asarray(params["b_ih"])[2 * H:])  # ih gate n
    put(10, params["w_out"], params["b_out"])      # out (+bias)

    return dict(
        H=H, V=V, L=L,
        embedding=params["embedding"],                      # f32, gathered host-side
        wslab=jnp.asarray(w_np, weight_dtype),              # bf16 MXU operand
        bslab=jnp.asarray(b_np, jnp.float32),               # f32 biases
    )


# --------------------------------------------------------------------------- #
# Fused decode wrapper: ONE pallas_call for T teacher-forced steps.
# --------------------------------------------------------------------------- #
def make_decode_fn(packed):
    H, V, L = packed["H"], packed["V"], packed["L"]
    width = packed["wslab"].shape[1]
    cdt = packed["wslab"].dtype
    kernel = functools.partial(attn_decoder_kernel, V=V, L=L)

    def decode(tokens, hidden, encoder_outputs):
        T = tokens.shape[0]

        # One gather + padding for the whole sequence (no per-step host glue).
        emb_rows = jnp.take(packed["embedding"], tokens, axis=0)        # (T, H)
        emb_all = jnp.zeros((T, 1, LANE), cdt).at[:, 0, 0:H].set(emb_rows.astype(cdt))
        h0 = jnp.zeros((1, LANE), jnp.float32).at[0, 0:H].set(hidden.reshape(H))
        enc = jnp.zeros((LANE, LANE), cdt).at[0:L, 0:H].set(encoder_outputs.astype(cdt))

        out = pl.pallas_call(
            kernel,
            out_shape=jax.ShapeDtypeStruct((T, 1, 3 * LANE), jnp.float32),
            grid_spec=pltpu.PrefetchScalarGridSpec(
                num_scalar_prefetch=0,
                grid=(T,),
                in_specs=[
                    pl.BlockSpec((None, 1, LANE), lambda t: (t, 0, 0)),   # emb row / step
                    pl.BlockSpec((1, LANE), lambda t: (0, 0)),            # h0 (resident)
                    pl.BlockSpec((LANE, LANE), lambda t: (0, 0)),         # enc (resident)
                    pl.BlockSpec((LANE, width), lambda t: (0, 0)),        # weights (resident)
                    pl.BlockSpec((1, width), lambda t: (0, 0)),           # biases (resident)
                ],
                out_specs=pl.BlockSpec((None, 1, 3 * LANE), lambda t: (t, 0, 0)),
                scratch_shapes=[pltpu.VMEM((1, LANE), jnp.float32)],      # carried hidden
            ),
            compiler_params=pltpu.CompilerParams(
                dimension_semantics=("arbitrary",),   # sequential: hidden carry
            ),
        )(emb_all, h0, enc, packed["wslab"], packed["bslab"])

        logp_seq = out[:, 0, 0:V]                          # (T, V)
        h_seq = out[:, 0, LANE:LANE + H]                   # (T, H)
        attn_seq = out[:, 0, 2 * LANE:2 * LANE + L]        # (T, L)
        return logp_seq, h_seq, attn_seq

    return jax.jit(decode)


def attn_decoder_forward(token, hidden, encoder_outputs, decode_fn):
    """Single-step forward with the original module's signature/semantics."""
    tokens = jnp.reshape(token, (1,)).astype(jnp.int32)
    logp, h_seq, attn_w = decode_fn(tokens, hidden, encoder_outputs)
    return logp, h_seq.reshape(1, 1, -1), attn_w


# --------------------------------------------------------------------------- #
# Pure-JAX f32 reference (for sanity check only)
# --------------------------------------------------------------------------- #
def reference_forward(token, hidden, encoder_outputs, params):
    H = params["hidden_size"]
    emb = jnp.take(params["embedding"], token, axis=0).reshape(1, H)
    hid = hidden.reshape(1, H)
    xh = jnp.concatenate([emb, hid], axis=1)
    attn_w = jax.nn.softmax(xh @ params["w_attn"] + params["b_attn"][None], axis=1)
    attn_applied = attn_w @ encoder_outputs
    x = jnp.concatenate([emb, attn_applied], axis=1) @ params["w_comb"] + params["b_comb"][None]
    x = jax.nn.relu(x)
    gi = x @ params["w_ih"] + params["b_ih"][None]
    gh = hid @ params["w_hh"] + params["b_hh"][None]
    r = jax.nn.sigmoid(gi[:, :H] + gh[:, :H])
    z = jax.nn.sigmoid(gi[:, H:2 * H] + gh[:, H:2 * H])
    n = jnp.tanh(gi[:, 2 * H:] + r * gh[:, 2 * H:])
    h_new = (1.0 - z) * n + z * hid
    logp = jax.nn.log_softmax(h_new @ params["w_out"] + params["b_out"][None], axis=1)
    return logp, h_new.reshape(1, 1, H), attn_w


def reference_decode(tokens, hidden, encoder_outputs, params):
    logps, hs, attns = [], [], []
    h = hidden
    for t in range(tokens.shape[0]):
        lp, h, aw = reference_forward(tokens[t], h, encoder_outputs, params)
        logps.append(lp)
        hs.append(h.reshape(1, -1))
        attns.append(aw)
    return (jnp.concatenate(logps, 0), jnp.concatenate(hs, 0),
            jnp.concatenate(attns, 0))


# --------------------------------------------------------------------------- #
if __name__ == "__main__":
    H, V, L = 32, 64, MAX_LENGTH
    key = jax.random.PRNGKey(0)
    k_param, k_hid, k_enc, k_tok = jax.random.split(key, 4)

    params = init_params(k_param, H, V, L)
    packed = pack_params(params)            # bf16 MXU slab, f32 biases
    decode_fn = make_decode_fn(packed)

    token = jnp.array(3, dtype=jnp.int32)
    hidden = jax.random.normal(k_hid, (1, 1, H), jnp.float32)
    encoder_outputs = jax.random.normal(k_enc, (L, H), jnp.float32)

    # ---- single-step forward (matches the PyTorch module's forward) --------
    logp, h_new, attn_w = attn_decoder_forward(token, hidden, encoder_outputs, decode_fn)
    jax.block_until_ready(logp)
    jax.block_until_ready(h_new)
    jax.block_until_ready(attn_w)
    assert logp.shape == (1, V) and h_new.shape == (1, 1, H) and attn_w.shape == (1, L)

    with jax.default_matmul_precision("highest"):
        ref_logp, ref_h, ref_attn = reference_forward(token, hidden, encoder_outputs, params)
    np.testing.assert_allclose(np.asarray(logp), np.asarray(ref_logp), rtol=5e-2, atol=5e-2)
    np.testing.assert_allclose(np.asarray(h_new), np.asarray(ref_h), rtol=5e-2, atol=5e-2)
    np.testing.assert_allclose(np.asarray(attn_w), np.asarray(ref_attn), rtol=5e-2, atol=5e-2)

    # ---- fused multi-step decode (one pallas_call for all steps) -----------
    T = 6
    tokens = jax.random.randint(k_tok, (T,), 0, V).astype(jnp.int32)
    logp_seq, h_seq, attn_seq = decode_fn(tokens, hidden, encoder_outputs)
    jax.block_until_ready(logp_seq)
    assert logp_seq.shape == (T, V) and h_seq.shape == (T, H) and attn_seq.shape == (T, L)

    with jax.default_matmul_precision("highest"):
        ref_lseq, ref_hseq, ref_aseq = reference_decode(tokens, hidden, encoder_outputs, params)
    np.testing.assert_allclose(np.asarray(logp_seq), np.asarray(ref_lseq), rtol=5e-2, atol=5e-2)
    np.testing.assert_allclose(np.asarray(h_seq), np.asarray(ref_hseq), rtol=5e-2, atol=5e-2)
    np.testing.assert_allclose(np.asarray(attn_seq), np.asarray(ref_aseq), rtol=5e-2, atol=5e-2)

    print("KERNEL_OK")
</pallas_src>

<mosaic_0001>
module attributes {stable_mosaic.version = 11 : i64} {
  func.func @attn_decoder_kernel(%arg0: i32, %arg1: memref<1x1x128xbf16, #tpu.memory_space<vmem>>, %arg2: memref<1x128xf32, #tpu.memory_space<vmem>>, %arg3: memref<128x128xbf16, #tpu.memory_space<vmem>>, %arg4: memref<128x1408xbf16, #tpu.memory_space<vmem>>, %arg5: memref<1x1408xf32, #tpu.memory_space<vmem>>, %arg6: memref<1x1x384xf32, #tpu.memory_space<vmem>>, %arg7: memref<1x128xf32, #tpu.memory_space<vmem>>) attributes {dimension_semantics = [#tpu.dimension_semantics<arbitrary>], iteration_bounds = array<i64: 1>, scalar_prefetch = 0 : i64, scratch_operands = 1 : i64, tpu.core_type = #tpu.core_type<tc>, window_params = [{transform_indices = @transform_0, window_bounds = array<i64: 1, 1, 128>}, {pipeline_mode = #tpu.pipeline_mode<synchronous>, transform_indices = @transform_1, window_bounds = array<i64: 1, 128>}, {pipeline_mode = #tpu.pipeline_mode<synchronous>, transform_indices = @transform_2, window_bounds = array<i64: 128, 128>}, {pipeline_mode = #tpu.pipeline_mode<synchronous>, transform_indices = @transform_3, window_bounds = array<i64: 128, 1408>}, {pipeline_mode = #tpu.pipeline_mode<synchronous>, transform_indices = @transform_4, window_bounds = array<i64: 1, 1408>}, {transform_indices = @transform_5, window_bounds = array<i64: 1, 1, 384>}]} {
    %c0_i32 = arith.constant 0 : i32
    %0 = arith.cmpi eq, %arg0, %c0_i32 : i32
    %1 = arith.extui %0 : i1 to i32
    %c0_i32_0 = arith.constant 0 : i32
    %2 = arith.cmpi ne, %1, %c0_i32_0 : i32
    scf.if %2 {
      %c0_48 = arith.constant 0 : index
      %c0_49 = arith.constant 0 : index
      %108 = vector.load %arg2[%c0_48, %c0_49] : memref<1x128xf32, #tpu.memory_space<vmem>>, vector<1x128xf32>
      %c0_50 = arith.constant 0 : index
      %c0_51 = arith.constant 0 : index
      %109 = vector.load %arg7[%c0_50, %c0_51] : memref<1x128xf32, #tpu.memory_space<vmem>>, vector<1x128xf32>
      tpu.vector_store %arg7[%c0_50, %c0_51], %108 {strides = array<i32>} : memref<1x128xf32, #tpu.memory_space<vmem>>, vector<1x128xf32>,
    } else {
    }
    %3 = tpu.iota {dimensions = array<i32: 1>} : vector<1x128xi32>
    %c0 = arith.constant 0 : index
    %c0_1 = arith.constant 0 : index
    %c0_2 = arith.constant 0 : index
    %4 = vector.load %arg1[%c0, %c0_1, %c0_2] : memref<1x1x128xbf16, #tpu.memory_space<vmem>>, vector<1x1x128xbf16>
    %5 = vector.shape_cast %4 : vector<1x1x128xbf16> to vector<1x128xbf16>
    %c0_3 = arith.constant 0 : index
    %c0_4 = arith.constant 0 : index
    %6 = vector.load %arg7[%c0_3, %c0_4] : memref<1x128xf32, #tpu.memory_space<vmem>>, vector<1x128xf32>
    %c0_5 = arith.constant 0 : index
    %c0_6 = arith.constant 0 : index
    %7 = vector.load %arg4[%c0_5, %c0_6] : memref<128x1408xbf16, #tpu.memory_space<vmem>>, vector<128x256xbf16>
    %cst = arith.constant dense<0.000000e+00> : vector<1x256xf32>
    %8 = tpu.matmul %5, %7, %cst {dimension_numbers = #tpu.dot_dimension_numbers<[1], [0], [0], [1], [0, 0, 1, 1], [], []>} : vector<1x128xbf16>, vector<128x256xbf16>, vector<1x256xf32> -> vector<1x256xf32>
    %c0_7 = arith.constant 0 : index
    %c0_8 = arith.constant 0 : index
    %9 = vector.load %arg5[%c0_7, %c0_8] : memref<1x1408xf32, #tpu.memory_space<vmem>>, vector<1x256xf32>
    %10 = arith.addf %8, %9 : vector<1x256xf32>
    %11 = arith.truncf %6 : vector<1x128xf32> to vector<1x128xbf16>
    %c0_9 = arith.constant 0 : index
    %c256 = arith.constant 256 : index
    %12 = vector.load %arg4[%c0_9, %c256] : memref<128x1408xbf16, #tpu.memory_space<vmem>>, vector<128x512xbf16>
    %cst_10 = arith.constant dense<0.000000e+00> : vector<1x512xf32>
    %13 = tpu.matmul %11, %12, %cst_10 {dimension_numbers = #tpu.dot_dimension_numbers<[1], [0], [0], [1], [0, 0, 1, 1], [], []>} : vector<1x128xbf16>, vector<128x512xbf16>, vector<1x512xf32> -> vector<1x512xf32>
    %c0_11 = arith.constant 0 : index
    %c256_12 = arith.constant 256 : index
    %14 = vector.load %arg5[%c0_11, %c256_12] : memref<1x1408xf32, #tpu.memory_space<vmem>>, vector<1x512xf32>
    %15 = arith.addf %13, %14 : vector<1x512xf32>
    %16 = vector.extract_strided_slice %10 {offsets = [0, 0], sizes = [1, 128], strides = [1, 1]} : vector<1x256xf32> to vector<1x128xf32>
    %17 = vector.extract_strided_slice %15 {offsets = [0, 0], sizes = [1, 128], strides = [1, 1]} : vector<1x512xf32> to vector<1x128xf32>
    %18 = arith.addf %16, %17 : vector<1x128xf32>
    %19 = vector.extract_strided_slice %10 {offsets = [0, 128], sizes = [1, 128], strides = [1, 1]} : vector<1x256xf32> to vector<1x128xf32>
    %20 = vector.extract_strided_slice %15 {offsets = [0, 128], sizes = [1, 128], strides = [1, 1]} : vector<1x512xf32> to vector<1x128xf32>
    %21 = vector.extract_strided_slice %15 {offsets = [0, 256], sizes = [1, 128], strides = [1, 1]} : vector<1x512xf32> to vector<1x128xf32>
    %22 = vector.extract_strided_slice %15 {offsets = [0, 384], sizes = [1, 128], strides = [1, 1]} : vector<1x512xf32> to vector<1x128xf32>
    %c10_i32 = arith.constant 10 : i32
    %23 = vector.broadcast %c10_i32 : i32 to vector<1x128xi32>
    %24 = arith.cmpi slt, %3, %23 : vector<1x128xi32>
    %cst_13 = arith.constant 0xFF800000 : f32
    %25 = vector.broadcast %cst_13 : f32 to vector<1x128xf32>
    %26 = arith.select %24, %18, %25 : vector<1x128xi1>, vector<1x128xf32>
    %cst_14 = arith.constant dense<0xFF800000> : vector<1xf32>
    %27 = vector.multi_reduction <maximumf>, %26, %cst_14 [1] : vector<1x128xf32> to vector<1xf32>
    %28 = vector.shape_cast %27 : vector<1xf32> to vector<1x1xf32>
    %29 = vector.broadcast %28 : vector<1x1xf32> to vector<1x128xf32>
    %30 = arith.subf %26, %29 : vector<1x128xf32>
    %31 = math.exp %30 : vector<1x128xf32>
    %cst_15 = arith.constant dense<0.000000e+00> : vector<1xf32>
    %32 = vector.multi_reduction <add>, %31, %cst_15 [1] : vector<1x128xf32> to vector<1xf32>
    %33 = vector.shape_cast %32 : vector<1xf32> to vector<1x1xf32>
    %34 = tpu.reciprocal %33 : vector<1x1xf32> -> vector<1x1xf32>
    %35 = vector.broadcast %34 : vector<1x1xf32> to vector<1x128xf32>
    %36 = arith.mulf %31, %35 : vector<1x128xf32>
    %37 = arith.truncf %36 : vector<1x128xf32> to vector<1x128xbf16>
    %c0_16 = arith.constant 0 : index
    %c0_17 = arith.constant 0 : index
    %38 = vector.load %arg3[%c0_16, %c0_17] : memref<128x128xbf16, #tpu.memory_space<vmem>>, vector<128x128xbf16>
    %cst_18 = arith.constant dense<0.000000e+00> : vector<1x128xf32>
    %39 = tpu.matmul %37, %38, %cst_18 {dimension_numbers = #tpu.dot_dimension_numbers<[1], [0], [0], [1], [0, 0, 1, 1], [], []>} : vector<1x128xbf16>, vector<128x128xbf16>, vector<1x128xf32> -> vector<1x128xf32>
    %40 = arith.truncf %39 : vector<1x128xf32> to vector<1x128xbf16>
    %c0_19 = arith.constant 0 : index
    %c768 = arith.constant 768 : index
    %41 = vector.load %arg4[%c0_19, %c768] : memref<128x1408xbf16, #tpu.memory_space<vmem>>, vector<128x128xbf16>
    %cst_20 = arith.constant dense<0.000000e+00> : vector<1x128xf32>
    %42 = tpu.matmul %40, %41, %cst_20 {dimension_numbers = #tpu.dot_dimension_numbers<[1], [0], [0], [1], [0, 0, 1, 1], [], []>} : vector<1x128xbf16>, vector<128x128xbf16>, vector<1x128xf32> -> vector<1x128xf32>
    %43 = arith.addf %19, %42 : vector<1x128xf32>
    %cst_21 = arith.constant 0.000000e+00 : f32
    %44 = vector.broadcast %cst_21 : f32 to vector<1x128xf32>
    %45 = arith.maximumf %43, %44 : vector<1x128xf32>
    %46 = arith.truncf %45 : vector<1x128xf32> to vector<1x128xbf16>
    %c0_22 = arith.constant 0 : index
    %c896 = arith.constant 896 : index
    %47 = vector.load %arg4[%c0_22, %c896] : memref<128x1408xbf16, #tpu.memory_space<vmem>>, vector<128x384xbf16>
    %cst_23 = arith.constant dense<0.000000e+00> : vector<1x384xf32>
    %48 = tpu.matmul %46, %47, %cst_23 {dimension_numbers = #tpu.dot_dimension_numbers<[1], [0], [0], [1], [0, 0, 1, 1], [], []>} : vector<1x128xbf16>, vector<128x384xbf16>, vector<1x384xf32> -> vector<1x384xf32>
    %c0_24 = arith.constant 0 : index
    %c896_25 = arith.constant 896 : index
    %49 = vector.load %arg5[%c0_24, %c896_25] : memref<1x1408xf32, #tpu.memory_space<vmem>>, vector<1x384xf32>
    %50 = arith.addf %48, %49 : vector<1x384xf32>
    %51 = vector.extract_strided_slice %50 {offsets = [0, 0], sizes = [1, 128], strides = [1, 1]} : vector<1x384xf32> to vector<1x128xf32>
    %52 = vector.extract_strided_slice %50 {offsets = [0, 128], sizes = [1, 128], strides = [1, 1]} : vector<1x384xf32> to vector<1x128xf32>
    %53 = vector.extract_strided_slice %50 {offsets = [0, 256], sizes = [1, 128], strides = [1, 1]} : vector<1x384xf32> to vector<1x128xf32>
    %54 = arith.addf %51, %20 : vector<1x128xf32>
    %55 = arith.negf %54 : vector<1x128xf32>
    %56 = math.exp %55 : vector<1x128xf32>
    %cst_26 = arith.constant 1.000000e+00 : f32
    %57 = vector.broadcast %cst_26 : f32 to vector<1x128xf32>
    %58 = arith.addf %57, %56 : vector<1x128xf32>
    %59 = arith.divf %57, %58 : vector<1x128xf32>
    %60 = arith.addf %52, %21 : vector<1x128xf32>
    %61 = arith.negf %60 : vector<1x128xf32>
    %62 = math.exp %61 : vector<1x128xf32>
    %cst_27 = arith.constant 1.000000e+00 : f32
    %63 = vector.broadcast %cst_27 : f32 to vector<1x128xf32>
    %64 = arith.addf %63, %62 : vector<1x128xf32>
    %65 = arith.divf %63, %64 : vector<1x128xf32>
    %66 = arith.mulf %59, %22 : vector<1x128xf32>
    %67 = arith.addf %53, %66 : vector<1x128xf32>
    %68 = math.tanh %67 : vector<1x128xf32>
    %cst_28 = arith.constant 1.000000e+00 : f32
    %69 = vector.broadcast %cst_28 : f32 to vector<1x128xf32>
    %70 = arith.subf %69, %65 : vector<1x128xf32>
    %71 = arith.mulf %70, %68 : vector<1x128xf32>
    %72 = arith.mulf %65, %6 : vector<1x128xf32>
    %73 = arith.addf %71, %72 : vector<1x128xf32>
    %c0_29 = arith.constant 0 : index
    %c0_30 = arith.constant 0 : index
    %74 = vector.load %arg7[%c0_29, %c0_30] : memref<1x128xf32, #tpu.memory_space<vmem>>, vector<1x128xf32>
    tpu.vector_store %arg7[%c0_29, %c0_30], %73 {strides = array<i32>} : memref<1x128xf32, #tpu.memory_space<vmem>>, vector<1x128xf32>,
    %75 = arith.truncf %73 : vector<1x128xf32> to vector<1x128xbf16>
    %c0_31 = arith.constant 0 : index
    %c1280 = arith.constant 1280 : index
    %76 = vector.load %arg4[%c0_31, %c1280] : memref<128x1408xbf16, #tpu.memory_space<vmem>>, vector<128x128xbf16>
    %cst_32 = arith.constant dense<0.000000e+00> : vector<1x128xf32>
    %77 = tpu.matmul %75, %76, %cst_32 {dimension_numbers = #tpu.dot_dimension_numbers<[1], [0], [0], [1], [0, 0, 1, 1], [], []>} : vector<1x128xbf16>, vector<128x128xbf16>, vector<1x128xf32> -> vector<1x128xf32>
    %c0_33 = arith.constant 0 : index
    %c1280_34 = arith.constant 1280 : index
    %78 = vector.load %arg5[%c0_33, %c1280_34] : memref<1x1408xf32, #tpu.memory_space<vmem>>, vector<1x128xf32>
    %79 = arith.addf %77, %78 : vector<1x128xf32>
    %c64_i32 = arith.constant 64 : i32
    %80 = vector.broadcast %c64_i32 : i32 to vector<1x128xi32>
    %81 = arith.cmpi slt, %3, %80 : vector<1x128xi32>
    %cst_35 = arith.constant 0xFF800000 : f32
    %82 = vector.broadcast %cst_35 : f32 to vector<1x128xf32>
    %83 = arith.select %81, %79, %82 : vector<1x128xi1>, vector<1x128xf32>
    %cst_36 = arith.constant dense<0xFF800000> : vector<1xf32>
    %84 = vector.multi_reduction <maximumf>, %83, %cst_36 [1] : vector<1x128xf32> to vector<1xf32>
    %85 = vector.shape_cast %84 : vector<1xf32> to vector<1x1xf32>
    %86 = vector.broadcast %85 : vector<1x1xf32> to vector<1x128xf32>
    %87 = arith.subf %83, %86 : vector<1x128xf32>
    %88 = math.exp %87 : vector<1x128xf32>
    %cst_37 = arith.constant dense<0.000000e+00> : vector<1xf32>
    %89 = vector.multi_reduction <add>, %88, %cst_37 [1] : vector<1x128xf32> to vector<1xf32>
    %90 = vector.shape_cast %89 : vector<1xf32> to vector<1x1xf32>
    %91 = math.log %90 : vector<1x1xf32>
    %92 = arith.addf %85, %91 : vector<1x1xf32>
    %c64_i32_38 = arith.constant 64 : i32
    %93 = vector.broadcast %c64_i32_38 : i32 to vector<1x128xi32>
    %94 = arith.cmpi slt, %3, %93 : vector<1x128xi32>
    %95 = vector.broadcast %92 : vector<1x1xf32> to vector<1x128xf32>
    %96 = arith.subf %83, %95 : vector<1x128xf32>
    %cst_39 = arith.constant 0.000000e+00 : f32
    %97 = vector.broadcast %cst_39 : f32 to vector<1x128xf32>
    %98 = arith.select %94, %96, %97 : vector<1x128xi1>, vector<1x128xf32>
    %c0_40 = arith.constant 0 : index
    %c0_41 = arith.constant 0 : index
    %c0_42 = arith.constant 0 : index
    %99 = vector.load %arg6[%c0_40, %c0_41, %c0_42] : memref<1x1x384xf32, #tpu.memory_space<vmem>>, vector<1x1x128xf32>
    %100 = vector.shape_cast %99 : vector<1x1x128xf32> to vector<1x128xf32>
    %101 = vector.shape_cast %98 : vector<1x128xf32> to vector<1x1x128xf32>
    tpu.vector_store %arg6[%c0_40, %c0_41, %c0_42], %101 {strides = array<i32>} : memref<1x1x384xf32, #tpu.memory_space<vmem>>, vector<1x1x128xf32>,
    %c0_43 = arith.constant 0 : index
    %c0_44 = arith.constant 0 : index
    %c128 = arith.constant 128 : index
    %102 = vector.load %arg6[%c0_43, %c0_44, %c128] : memref<1x1x384xf32, #tpu.memory_space<vmem>>, vector<1x1x128xf32>
    %103 = vector.shape_cast %102 : vector<1x1x128xf32> to vector<1x128xf32>
    %104 = vector.shape_cast %73 : vector<1x128xf32> to vector<1x1x128xf32>
    tpu.vector_store %arg6[%c0_43, %c0_44, %c128], %104 {strides = array<i32>} : memref<1x1x384xf32, #tpu.memory_space<vmem>>, vector<1x1x128xf32>,
    %c0_45 = arith.constant 0 : index
    %c0_46 = arith.constant 0 : index
    %c256_47 = arith.constant 256 : index
    %105 = vector.load %arg6[%c0_45, %c0_46, %c256_47] : memref<1x1x384xf32, #tpu.memory_space<vmem>>, vector<1x1x128xf32>
    %106 = vector.shape_cast %105 : vector<1x1x128xf32> to vector<1x128xf32>
    %107 = vector.shape_cast %36 : vector<1x128xf32> to vector<1x1x128xf32>
    tpu.vector_store %arg6[%c0_45, %c0_46, %c256_47], %107 {strides = array<i32>} : memref<1x1x384xf32, #tpu.memory_space<vmem>>, vector<1x1x128xf32>,
    return
  }
  func.func @transform_0(%arg0: i32) -> (i32, i32, i32) {
    %c0_i32 = arith.constant 0 : i32
    %c0_i32_0 = arith.constant 0 : i32
    %c0_i32_1 = arith.constant 0 : i32
    return %arg0, %c0_i32, %c0_i32_0 : i32, i32, i32
  }
  func.func @transform_1(%arg0: i32) -> (i32, i32) {
    %c0_i32 = arith.constant 0 : i32
    %c0_i32_0 = arith.constant 0 : i32
    %c0_i32_1 = arith.constant 0 : i32
    return %c0_i32, %c0_i32_0 : i32, i32
  }
  func.func @transform_2(%arg0: i32) -> (i32, i32) {
    %c0_i32 = arith.constant 0 : i32
    %c0_i32_0 = arith.constant 0 : i32
    %c0_i32_1 = arith.constant 0 : i32
    return %c0_i32, %c0_i32_0 : i32, i32
  }
  func.func @transform_3(%arg0: i32) -> (i32, i32) {
    %c0_i32 = arith.constant 0 : i32
    %c0_i32_0 = arith.constant 0 : i32
    %c0_i32_1 = arith.constant 0 : i32
    return %c0_i32, %c0_i32_0 : i32, i32
  }
  func.func @transform_4(%arg0: i32) -> (i32, i32) {
    %c0_i32 = arith.constant 0 : i32
    %c0_i32_0 = arith.constant 0 : i32
    %c0_i32_1 = arith.constant 0 : i32
    return %c0_i32, %c0_i32_0 : i32, i32
  }
  func.func @transform_5(%arg0: i32) -> (i32, i32, i32) {
    %c0_i32 = arith.constant 0 : i32
    %c0_i32_0 = arith.constant 0 : i32
    %c0_i32_1 = arith.constant 0 : i32
    return %arg0, %c0_i32, %c0_i32_0 : i32, i32, i32
  }
}

</mosaic_0001>

<bundles_post_ra>
// kernel: decode.1
= control target key start
LH: loop header
LB: loop body
LE: loop exit
PB: predicated region body
PF: predicated region fallthrough
CT: control target
= control target key end

     0   :  { %v1481_v1 = vmov 0   ;;  %v27_v37 = vlaneseq  ;;  %vm480_vm1 = vcmask 1040384   ;;  %v1482_v58 = vmov 0.0   ;;  %s1944_s3 = inlined_call_operand.vmem [shape: bf16[128,1408], index: 3, kind: input, shape index: {}]   ;;  %s1945_s1 = inlined_call_operand.vmem [shape: f32[1,128], index: 1, kind: input, shape index: {}]   ;;  %s1946_s0 = inlined_call_operand.vmem [shape: bf16[1,1,128], index: 0, kind: input, shape index: {}]   ;;  %s1947_s4 = inlined_call_operand.vmem [shape: f32[1,1408], index: 4, kind: input, shape index: {}]   ;;  %s1948_s2 = inlined_call_operand.vmem [shape: bf16[128,128], index: 2, kind: input, shape index: {}]   ;;  %s1949_s5 = inlined_call_operand.vmem [shape: f32[1,1,384], index: 5, kind: output, shape index: {}]  }
   0x1   :  { %v1335_v0 = vld [vmem:[%s1944_s3 + $0x4] ss:$44 sps:$4 sm:$0xff]   ;;  %171 = vmatprep.mubr.bf16.mxu0 %v1481_v1  ;;  %427 = vmatprep.mubr.bf16.mxu1 %v1481_v1  ;;  %v1337_v2 = vld [vmem:[%s1944_s3 + $0xc] ss:$44 sps:$4 sm:$0xff]   ;;  %v1340_v4 = vld [vmem:[%s1944_s3 + $0x8] ss:$44 sps:$4 sm:$0xff]  }
   0x2   :  { %139 = vmatprep.subr.bf16.mxu0 %v1335_v0  ;;  %v1339_v3 = vld [vmem:[%s1944_s3] ss:$44 sps:$4 sm:$0xff]   ;;  %395 = vmatprep.subr.bf16.mxu1 %v1337_v2  ;;  %v1341_v5 = vld [vmem:[%s1944_s3 + $0x5c] ss:$44 sps:$4 sm:$0xff]   ;;  %v1343_v6 = vld [vmem:[%s1944_s3 + $0x64] ss:$44 sps:$4 sm:$0xff]  }
   0x3   :  { %140 = vmatpush1.bf16.msra.mxu0 %v1339_v3  ;;  %396 = vmatpush1.bf16.msra.mxu1 %v1340_v4  ;;  %v1345_v7 = vld [vmem:[%s1944_s3 + $0x58] ss:$44 sps:$4 sm:$0xff]   ;;  %v1346_v8 = vld [vmem:[%s1944_s3 + $0x60] ss:$44 sps:$4 sm:$0xff]   ;;  %v1349_v10 = vld [vmem:[%s1944_s3 + $0xbc] ss:$44 sps:$4 sm:$0xff]  }
   0x4   :  { %141 = vmatprep.subr.bf16.mxu0 %v1341_v5  ;;  %397 = vmatprep.subr.bf16.mxu1 %v1343_v6  ;;  %v1347_v9 = vld [vmem:[%s1944_s3 + $0xb4] ss:$44 sps:$4 sm:$0xff]   ;;  %v1351_v11 = vld [vmem:[%s1944_s3 + $0xb0] ss:$44 sps:$4 sm:$0xff]   ;;  %v1352_v12 = vld [vmem:[%s1944_s3 + $0xb8] ss:$44 sps:$4 sm:$0xff]  }
   0x5   :  { %v1353_v13 = vld [vmem:[%s1944_s3 + $0x10c] ss:$44 sps:$4 sm:$0xff]   ;;  %v1355_v14 = vld [vmem:[%s1944_s3 + $0x114] ss:$44 sps:$4 sm:$0xff]   ;;  %v1358_v16 = vld [vmem:[%s1944_s3 + $0x110] ss:$44 sps:$4 sm:$0xff]  }
   0x6   :  { %v1357_v15 = vld [vmem:[%s1944_s3 + $0x108] ss:$44 sps:$4 sm:$0xff]   ;;  %v1359_v17 = vld [vmem:[%s1944_s3 + $0x164] ss:$44 sps:$4 sm:$0xff]   ;;  %v1361_v18 = vld [vmem:[%s1944_s3 + $0x16c] ss:$44 sps:$4 sm:$0xff]  }
   0x7   :  { %142 = vmatpush1.bf16.msra.mxu0 %v1345_v7  ;;  %398 = vmatpush1.bf16.msra.mxu1 %v1346_v8  ;;  %v1363_v19 = vld [vmem:[%s1944_s3 + $0x160] ss:$44 sps:$4 sm:$0xff]   ;;  %v1364_v20 = vld [vmem:[%s1944_s3 + $0x168] ss:$44 sps:$4 sm:$0xff]   ;;  %v1367_v22 = vld [vmem:[%s1944_s3 + $0x1c4] ss:$44 sps:$4 sm:$0xff]  }
   0x8   :  { %143 = vmatprep.subr.bf16.mxu0 %v1347_v9  ;;  %399 = vmatprep.subr.bf16.mxu1 %v1349_v10  ;;  %v1365_v21 = vld [vmem:[%s1944_s3 + $0x1bc] ss:$44 sps:$4 sm:$0xff]   ;;  %v1369_v23 = vld [vmem:[%s1944_s3 + $0x1b8] ss:$44 sps:$4 sm:$0xff]   ;;  %v1370_v24 = vld [vmem:[%s1944_s3 + $0x1c0] ss:$44 sps:$4 sm:$0xff]  }
   0x9   :  { %v1371_v25 = vld [vmem:[%s1944_s3 + $0x214] ss:$44 sps:$4 sm:$0xff]   ;;  %v1373_v26 = vld [vmem:[%s1944_s3 + $0x21c] ss:$44 sps:$4 sm:$0xff]   ;;  %v1376_v29 = vld [vmem:[%s1944_s3 + $0x218] ss:$44 sps:$4 sm:$0xff]  }
   0xa   :  { %v25_v27 = vld [vmem:[%s1945_s1] sm:$0x1]  ;;  %v1375_v28 = vld [vmem:[%s1944_s3 + $0x210] ss:$44 sps:$4 sm:$0xff]   ;;  %v1377_v30 = vld [vmem:[%s1944_s3 + $0x26c] ss:$44 sps:$4 sm:$0xff]  }
   0xb   :  { %144 = vmatpush1.bf16.msra.mxu0 %v1351_v11  ;;  %400 = vmatpush1.bf16.msra.mxu1 %v1352_v12  ;;  %26 = vst [vmem:[#allocation2] sm:$0x1] %v25_v27  ;;  %v1379_v31 = vld [vmem:[%s1944_s3 + $0x274] ss:$44 sps:$4 sm:$0xff]   ;;  %v1382_v33 = vld [vmem:[%s1944_s3 + $0x270] ss:$44 sps:$4 sm:$0xff]  }
   0xc   :  { %145 = vmatprep.subr.bf16.mxu0 %v1353_v13  ;;  %401 = vmatprep.subr.bf16.mxu1 %v1355_v14  ;;  %v1381_v32 = vld [vmem:[%s1944_s3 + $0x268] ss:$44 sps:$4 sm:$0xff]   ;;  %v29_v35 = vld [vmem:[%s1946_s0] sm:$0x1]  ;;  %v1627_v38 = vshrl.u32 %v27_v37, 7  ;;  %v1647_v44 = vand.u32 127, %v27_v37 }
   0xd   :  { %v1635_v40 = vld [vmem:[%s1947_s4] sm:$0x3]  ;;  %v1640_v41 = vld [vmem:[%s1947_s4 + $0x2] sm:$0xf]  ;;  %v1384_v60 = vld [vmem:[%s1948_s2 + $0x8] sm:$0xff]   ;;  %vm1483_vm2 = vmmov 0  }
   0xe   :  { %v1630_v39 = vsub.s32 0, %v1627_v38  ;;  %vm478_vm0 = vcmp.lt.s32.totalorder %v1647_v44, 10  ;;  %v1383_v59 = vld [vmem:[%s1948_s2] sm:$0xff]   ;;  %v1385_v61 = vld [vmem:[%s1948_s2 + $0x10] sm:$0xff]   ;;  %v1386_v62 = vld [vmem:[%s1948_s2 + $0x18] sm:$0xff]   ;;  %vm1774_vm3 = vcmp.lt.s32.totalorder %v27_v37, 128 }
   0xf   :  { %146 = vmatpush1.bf16.msra.mxu0 %v1357_v15  ;;  %402 = vmatpush1.bf16.msra.mxu1 %v1358_v16  ;;  %v1387_v5 = vld [vmem:[%s1948_s2 + $0x20] sm:$0xff]   ;;  %v1388_v6 = vld [vmem:[%s1948_s2 + $0x28] sm:$0xff]   ;;  %v1389_v7 = vld [vmem:[%s1948_s2 + $0x30] sm:$0xff]   ;;  %vm1091_vm4 = vcmp.lt.s32.totalorder %v1647_v44, 64 }
  0x10   :  { %147 = vmatprep.subr.bf16.mxu0 %v1359_v17  ;;  %403 = vmatprep.subr.bf16.mxu1 %v1361_v18  ;;  %v132_v42 = vrot.slane %v1635_v40, %v1630_v39  ;;  %v378_v43 = vrot.slane %v1640_v41, %v1630_v39  ;;  %v1390_v8 = vld [vmem:[%s1948_s2 + $0x38] sm:$0xff]   ;;  %v1393_v10 = vld [vmem:[%s1944_s3 + $0x14] ss:$44 sps:$4 sm:$0xff]   ;;  %v1399_v13 = vld [vmem:[%s1944_s3 + $0xc4] ss:$44 sps:$4 sm:$0xff]  }
  0x11   :  { %v1391_v9 = vld [vmem:[%s1944_s3 + $0x10] ss:$44 sps:$4 sm:$0xff]   ;;  %v1396_v11 = vld [vmem:[%s1944_s3 + $0x6c] ss:$44 sps:$4 sm:$0xff]   ;;  %v1394_v12 = vld [vmem:[%s1944_s3 + $0x68] ss:$44 sps:$4 sm:$0xff]  }
  0x12   :  { %v1615_v34 = vld [vmem:[#allocation2] sm:$0x1]  ;;  %v1402_v15 = vld [vmem:[%s1944_s3 + $0x11c] ss:$44 sps:$4 sm:$0xff]   ;;  %v1400_v16 = vld [vmem:[%s1944_s3 + $0x118] ss:$44 sps:$4 sm:$0xff]  }
  0x13   :  { %148 = vmatpush1.bf16.msra.mxu0 %v1363_v19  ;;  %404 = vmatpush1.bf16.msra.mxu1 %v1364_v20  ;;  %v1622_v36 = vpack.c.bf16 %v1615_v34, %v1615_v34  ;;  %v1397_v14 = vld [vmem:[%s1944_s3 + $0xc0] ss:$44 sps:$4 sm:$0xff]   ;;  %v1403_v18 = vld [vmem:[%s1944_s3 + $0x170] ss:$44 sps:$4 sm:$0xff]   ;;  %v1406_v20 = vld [vmem:[%s1944_s3 + $0x1c8] ss:$44 sps:$4 sm:$0xff]  }
  0x14   :  { %149 = vmatprep.subr.bf16.mxu0 %v1365_v21  ;;  %405 = vmatprep.subr.bf16.mxu1 %v1367_v22  ;;  %v1405_v17 = vld [vmem:[%s1944_s3 + $0x174] ss:$44 sps:$4 sm:$0xff]   ;;  %v1408_v19 = vld [vmem:[%s1944_s3 + $0x1cc] ss:$44 sps:$4 sm:$0xff]   ;;  %v1411_v21 = vld [vmem:[%s1944_s3 + $0x224] ss:$44 sps:$4 sm:$0xff]  }
  0x15   :  { %v1409_v22 = vld [vmem:[%s1944_s3 + $0x220] ss:$44 sps:$4 sm:$0xff]   ;;  %v1417_v27 = vld [vmem:[%s1944_s3 + $0xc8] ss:$44 sps:$4 sm:$0xff]  }
  0x16   :  { %v1423_v37 = vld [vmem:[%s1944_s3 + $0x1c] ss:$44 sps:$4 sm:$0xff]  }
  0x17   :  { %150 = vmatpush1.bf16.msra.mxu0 %v1369_v23  ;;  %406 = vmatpush1.bf16.msra.mxu1 %v1370_v24  ;;  %v1414_v23 = vld [vmem:[%s1944_s3 + $0x27c] ss:$44 sps:$4 sm:$0xff]   ;;  %v1412_v24 = vld [vmem:[%s1944_s3 + $0x278] ss:$44 sps:$4 sm:$0xff]  }
  0x18   :  { %151 = vmatprep.subr.bf16.mxu0 %v1371_v25  ;;  %407 = vmatprep.subr.bf16.mxu1 %v1373_v26  ;;  %v1415_v25 = vld [vmem:[%s1944_s3 + $0x18] ss:$44 sps:$4 sm:$0xff]   ;;  %v1416_v26 = vld [vmem:[%s1944_s3 + $0x70] ss:$44 sps:$4 sm:$0xff]  }
  0x1b   :  { %152 = vmatpush1.bf16.msra.mxu0 %v1375_v28  ;;  %408 = vmatpush1.bf16.msra.mxu1 %v1376_v29  ;;  %v1418_v28 = vld [vmem:[%s1944_s3 + $0x120] ss:$44 sps:$4 sm:$0xff]   ;;  %v1419_v29 = vld [vmem:[%s1944_s3 + $0x178] ss:$44 sps:$4 sm:$0xff]  }
  0x1c   :  { %153 = vmatprep.subr.bf16.mxu0 %v1377_v30  ;;  %409 = vmatprep.subr.bf16.mxu1 %v1379_v31  ;;  %v1420_v30 = vld [vmem:[%s1944_s3 + $0x1d0] ss:$44 sps:$4 sm:$0xff]   ;;  %v1421_v31 = vld [vmem:[%s1944_s3 + $0x228] ss:$44 sps:$4 sm:$0xff]  }
  0x1f   :  { %154 = vmatpush1.bf16.msra.mxu0 %v1381_v32  ;;  %410 = vmatpush1.bf16.msra.mxu1 %v1382_v33 }
  0x20   :  { %1252 = vmatprep.subr.bf16.mxu1 %v1482_v58  ;;  %436 = vmatprep.subr.bf16.mxu0 %v1393_v10  ;;  %v1442_v10 = vld [vmem:[%s1944_s3 + $0x184] ss:$44 sps:$4 sm:$0xff]  }
  0x22   :  { %172 = vmatmul.mubr.bf16.vlgmr.msra.gmra.mrb[0].mxu0 %v29_v35  ;;  %428 = vmatmul.mubr.bf16.vlgmr.msra.gmra.mrb[0].mxu1 %v1622_v36 }
  0x23   :  { %468 = vmatprep.mubr.bf16.mxu0 %v1481_v1  ;;  %1253 = vmatpush3.bf16.msra.mxu1 %v1383_v59  ;;  %v1447_v59 = vld [vmem:[%s1944_s3 + $0x22c] ss:$44 sps:$4 sm:$0xff]  }
  0x24   :  { %1254 = vmatprep.subr.bf16.mxu1 %v1482_v58  ;;  %1268 = vmatprep.mubr.msk.bf16.mxu1 %vm1483_vm2, %v1482_v58 }
  0x25   :  { %437 = vmatpush1.bf16.msra.mxu0 %v1391_v9  ;;  %v1438_v9 = vld [vmem:[%s1944_s3 + $0x12c] ss:$44 sps:$4 sm:$0xff]  }
  0x26   :  { %438 = vmatprep.subr.bf16.mxu0 %v1396_v11  ;;  %v1446_v11 = vld [vmem:[%s1944_s3 + $0x1dc] ss:$44 sps:$4 sm:$0xff]  }
  0x27   :  { %1255 = vmatpush3.bf16.msra.mxu1 %v1384_v60 }
  0x28   :  { %1256 = vmatprep.subr.bf16.mxu1 %v1482_v58 }
  0x29   :  { %439 = vmatpush1.bf16.msra.mxu0 %v1394_v12  ;;  %v1450_v12 = vld [vmem:[%s1944_s3 + $0x234] ss:$44 sps:$4 sm:$0xff]  }
  0x2a   :  { %440 = vmatprep.subr.bf16.mxu0 %v1399_v13  ;;  %v1453_v13 = vld [vmem:[%s1944_s3 + $0x288] ss:$44 sps:$4 sm:$0xff]  }
  0x2b   :  { %1257 = vmatpush3.bf16.msra.mxu1 %v1385_v61 }
  0x2c   :  { %1258 = vmatprep.subr.bf16.mxu1 %v1482_v58 }
  0x2d   :  { %441 = vmatpush1.bf16.msra.mxu0 %v1397_v14  ;;  %v1451_v14 = vld [vmem:[%s1944_s3 + $0x284] ss:$44 sps:$4 sm:$0xff]  }
  0x2e   :  { %442 = vmatprep.subr.bf16.mxu0 %v1402_v15  ;;  %v1454_v15 = vld [vmem:[%s1944_s3 + $0x28c] ss:$44 sps:$4 sm:$0xff]  }
  0x2f   :  { %1259 = vmatpush3.bf16.msra.mxu1 %v1386_v62 }
  0x30   :  { %1260 = vmatprep.subr.bf16.mxu1 %v1482_v58 }
  0x31   :  { %443 = vmatpush1.bf16.msra.mxu0 %v1400_v16  ;;  %v135_v16 = vsub.s32 1, %v1627_v38 }
  0x32   :  { %444 = vmatprep.subr.bf16.mxu0 %v1405_v17 }
  0x33   :  { %1261 = vmatpush3.bf16.msra.mxu1 %v1387_v5  ;;  %v136_v17 = vrot.slane %v1635_v40, %v135_v16  ;;  %v1456_v40 = vld [vmem:[%s1944_s3 + $0x80] ss:$44 sps:$4 sm:$0xff]  }
  0x34   :  { %1262 = vmatprep.subr.bf16.mxu1 %v1482_v58 }
  0x35   :  { %445 = vmatpush1.bf16.msra.mxu0 %v1403_v18 }
  0x36   :  { %446 = vmatprep.subr.bf16.mxu0 %v1408_v19 }
  0x37   :  { %1263 = vmatpush3.bf16.msra.mxu1 %v1388_v6 }
  0x38   :  { %1264 = vmatprep.subr.bf16.mxu1 %v1482_v58 }
  0x39   :  { %447 = vmatpush1.bf16.msra.mxu0 %v1406_v20 }
  0x3a   :  { %448 = vmatprep.subr.bf16.mxu0 %v1411_v21 }
  0x3b   :  { %1265 = vmatpush3.bf16.msra.mxu1 %v1389_v7  ;;  %v1430_v7 = vld [vmem:[%s1944_s3 + $0x7c] ss:$44 sps:$4 sm:$0xff]  }
  0x3c   :  { %1266 = vmatprep.subr.bf16.mxu1 %v1482_v58 }
  0x3d   :  { %449 = vmatpush1.bf16.msra.mxu0 %v1409_v22 }
  0x3e   :  { %450 = vmatprep.subr.bf16.mxu0 %v1414_v23 }
  0x3f   :  { %1267 = vmatpush3.bf16.msra.mxu1 %v1390_v8  ;;  %v1434_v8 = vld [vmem:[%s1944_s3 + $0xd4] ss:$44 sps:$4 sm:$0xff]  }
  0x41   :  { %451 = vmatpush1.bf16.msra.mxu0 %v1412_v24 }
  0x42   :  { %1272 = vmatprep.subr.bf16.mxu0 %v1482_v58 }
  0x44   :  { %469 = vmatmul.mubr.bf16.vlgmr.msra.gmra.mrb[4].mxu0 %v1622_v36 }
  0x45   :  { %1273 = vmatpush3.bf16.msra.mxu0 %v1415_v25  ;;  %1288 = vmatprep.mubr.msk.bf16.mxu0 %vm1483_vm2, %v1482_v58 }
  0x46   :  { %1274 = vmatprep.subr.bf16.mxu0 %v1482_v58 }
  0x49   :  { %1275 = vmatpush3.bf16.msra.mxu0 %v1416_v26  ;;  %v1455_v26 = vld [vmem:[%s1944_s3 + $0x28] ss:$44 sps:$4 sm:$0xff]  }
  0x4a   :  { %1276 = vmatprep.subr.bf16.mxu0 %v1482_v58 }
  0x4d   :  { %1277 = vmatpush3.bf16.msra.mxu0 %v1417_v27  ;;  %v1458_v27 = vld [vmem:[%s1944_s3 + $0x130] ss:$44 sps:$4 sm:$0xff]  }
  0x4e   :  { %1278 = vmatprep.subr.bf16.mxu0 %v1482_v58 }
  0x51   :  { %1279 = vmatpush3.bf16.msra.mxu0 %v1418_v28  ;;  %v1459_v28 = vld [vmem:[%s1944_s3 + $0x188] ss:$44 sps:$4 sm:$0xff]  }
  0x52   :  { %1280 = vmatprep.subr.bf16.mxu0 %v1482_v58 }
  0x55   :  { %1281 = vmatpush3.bf16.msra.mxu0 %v1419_v29  ;;  %v1460_v29 = vld [vmem:[%s1944_s3 + $0x1e0] ss:$44 sps:$4 sm:$0xff]  }
  0x56   :  { %1282 = vmatprep.subr.bf16.mxu0 %v1482_v58 }
  0x59   :  { %1283 = vmatpush3.bf16.msra.mxu0 %v1420_v30  ;;  %v1461_v30 = vld [vmem:[%s1944_s3 + $0x238] ss:$44 sps:$4 sm:$0xff]  }
  0x5a   :  { %1284 = vmatprep.subr.bf16.mxu0 %v1482_v58 }
  0x5d   :  { %1285 = vmatpush3.bf16.msra.mxu0 %v1421_v31  ;;  %v1462_v31 = vld [vmem:[%s1944_s3 + $0x290] ss:$44 sps:$4 sm:$0xff]  }
  0x5e   :  { %1286 = vmatprep.subr.bf16.mxu0 %v1482_v58 }
  0xf5   :  { %v173_v45 = vpop.f32.mrb[0].mxu0  ;;  %v429_v46 = vpop.f32.mrb[0].mxu1 }
  0xf6   :  { %v174_v47 = vadd.f32 %v173_v45, %v132_v42  ;;  %v430_v48 = vadd.f32 %v429_v46, %v378_v43  ;;  %v1649_v49 = vpop.f32.mrb[1].mxu0  ;;  %v1651_v50 = vpop.f32.mrb[1].mxu1  ;;  %v1422_v43 = vld [vmem:[%s1944_s3 + $0x280] ss:$44 sps:$4 sm:$0xff]   ;;  %v1429_v46 = vld [vmem:[%s1944_s3 + $0x78] ss:$44 sps:$4 sm:$0xff]  }
  0xf7   :  { %v177_v51 = vpop.f32.mrb[2].mxu0  ;;  %v433_v52 = vpop.f32.mrb[2].mxu1  ;;  %1287 = vmatpush3.bf16.msra.mxu0 %v1422_v43  ;;  %v1425_v45 = vld [vmem:[%s1944_s3 + $0x20] ss:$44 sps:$4 sm:$0xff]   ;;  %v176_v18 = vadd.f32 %v1649_v49, %v136_v17  ;;  %v1457_v49 = vld [vmem:[%s1944_s3 + $0xd8] ss:$44 sps:$4 sm:$0xff]  }
  0xf8   :  { %v477_v53 = vadd.f32 %v430_v48, %v174_v47  ;;  %v178_v54 = vpop.f32.mrb[3].mxu0  ;;  %v434_v55 = vpop.f32.mrb[3].mxu1  ;;  %1292 = vmatprep.subr.bf16.mxu0 %v1482_v58  ;;  %882 = vmatprep.subr.bf16.mxu1 %v1425_v45  ;;  %v1433_v47 = vld [vmem:[%s1944_s3 + $0xd0] ss:$44 sps:$4 sm:$0xff]   ;;  %v1431_v48 = vld [vmem:[%s1944_s3 + $0xcc] ss:$44 sps:$4 sm:$0xff]  }
  0xf9   :  { %v1437_v51 = vld [vmem:[%s1944_s3 + $0x128] ss:$44 sps:$4 sm:$0xff]   ;;  %v1435_v52 = vld [vmem:[%s1944_s3 + $0x124] ss:$44 sps:$4 sm:$0xff]  }
  0xfa   :  { %v479_v56 = vsel %vm478_vm0, %v477_v53, -inf  ;;  %v1441_v53 = vld [vmem:[%s1944_s3 + $0x180] ss:$44 sps:$4 sm:$0xff]   ;;  %v1439_v54 = vld [vmem:[%s1944_s3 + $0x17c] ss:$44 sps:$4 sm:$0xff]  }
  0xfb   :  { %v481_v57 = vsel %vm480_vm1, %v479_v56, -inf  ;;  %v1445_v55 = vld [vmem:[%s1944_s3 + $0x1d8] ss:$44 sps:$4 sm:$0xff]  }
  0xfc   :  { %482 = vmax.xlane.f32.xlu0 %v481_v57  ;;  %v1449_v57 = vld [vmem:[%s1944_s3 + $0x230] ss:$44 sps:$4 sm:$0xff]  }
 0x117   :  { %v1831_v60 = vpop.f32.mrb[4].mxu0 }
 0x118   :  { %v1833_v61 = vpop.f32.mrb[5].mxu0 }
 0x119   :  { %v474_v62 = vpop.f32.mrb[6].mxu0 }
 0x189   :  { %v483_v63 = vpop.xlane.xlu0 %482 }
 0x18a   :  { %v484_v0 = vsub.f32 %v479_v56, %v483_v63  ;;  %v1443_v56 = vld [vmem:[%s1944_s3 + $0x1d4] ss:$44 sps:$4 sm:$0xff]   ;;  %v475_v63 = vpop.f32.mrb[7].mxu0 }
 0x18c   :  { %v485_v2 = vmul.f32 1.442695, %v484_v0 }
 0x18e   :  { %1463 = vpow2.f32 %v485_v2  ;;  %v1426_v2 = vld [vmem:[%s1944_s3 + $0x24] ss:$44 sps:$4 sm:$0xff]  }
 0x198   :  { %v1672_v3 = vpop.eup %1463 }
 0x199   :  { %v487_v4 = vsel %vm480_vm1, %v1672_v3, 0.0 }
 0x19a   :  { %488 = vadd.xlane.f32.xlu0 %v487_v4 }
 0x227   :  { %v489_v32 = vpop.xlane.xlu0 %488 }
 0x228   :  { %1465 = vrcp.f32 %v489_v32  ;;  %v385_v32 = vsub.s32 2, %v1627_v38 }
 0x22a   :  { %v386_v43 = vrot.slane %v1640_v41, %v385_v32 }
 0x232   :  { %v1466_v33 = vpop.eup %1465 }
 0x233   :  { %v491_v36 = vmul.f32 %v1466_v33, %v1672_v3  ;;  %v737_v33 = vld [vmem:[%s1947_s4 + $0x7] sm:$0x7] }
 0x235   :  { %v492_v42 = vpack.c.bf16 %v491_v36, %v491_v36  ;;  %1113 = vst.msk [vmem:[%s1949_s5 + $0x2] sm:$0x1] %vm1774_vm3, %v491_v36  ;;  %v382_v36 = vrot.slane %v1640_v41, %v135_v16 }
 0x237   :  { %1269 = vmatmul.mubr.bf16.vlgmr.msra.gmra.mrb[4].mxu1 %v492_v42  ;;  %v870_v42 = vrot.slane %v737_v33, %v1630_v39 }
 0x238   :  { %914 = vmatprep.mubr.bf16.mxu1 %v1481_v1  ;;  %883 = vmatpush1.bf16.msra.mxu1 %v1423_v37  ;;  %v1427_v1 = vld [vmem:[%s1944_s3 + $0x74] ss:$44 sps:$4 sm:$0xff]   ;;  %v874_v37 = vrot.slane %v737_v33, %v135_v16 }
 0x239   :  { %884 = vmatprep.subr.bf16.mxu1 %v1429_v46 }
 0x23c   :  { %885 = vmatpush1.bf16.msra.mxu1 %v1427_v1  ;;  %v432_v1 = vadd.f32 %v1651_v50, %v382_v36  ;;  %v389_v50 = vsub.s32 3, %v1627_v38 }
 0x23d   :  { %886 = vmatprep.subr.bf16.mxu1 %v1433_v47 }
 0x240   :  { %887 = vmatpush1.bf16.msra.mxu1 %v1431_v48 }
 0x241   :  { %888 = vmatprep.subr.bf16.mxu1 %v1437_v51  ;;  %v471_v51 = vadd.f32 %v1831_v60, %v386_v43  ;;  %v878_v60 = vrot.slane %v737_v33, %v385_v32 }
 0x244   :  { %889 = vmatpush1.bf16.msra.mxu1 %v1435_v52 }
 0x245   :  { %890 = vmatprep.subr.bf16.mxu1 %v1441_v53 }
 0x248   :  { %891 = vmatpush1.bf16.msra.mxu1 %v1439_v54 }
 0x249   :  { %892 = vmatprep.subr.bf16.mxu1 %v1445_v55 }
 0x24c   :  { %893 = vmatpush1.bf16.msra.mxu1 %v1443_v56 }
 0x24d   :  { %894 = vmatprep.subr.bf16.mxu1 %v1449_v57 }
 0x250   :  { %895 = vmatpush1.bf16.msra.mxu1 %v1447_v59 }
 0x251   :  { %896 = vmatprep.subr.bf16.mxu1 %v1453_v13 }
 0x254   :  { %897 = vmatpush1.bf16.msra.mxu1 %v1451_v14 }
 0x255   :  { %1312 = vmatprep.subr.bf16.mxu1 %v1482_v58 }
 0x30a   :  { %v591_v0 = vpop.f32.mrb[4].mxu1 }
 0x30b   :  { %v597_v3 = vpack.c.bf16 %v591_v0, %v591_v0  ;;  %v1270_v4 = vpop.f32.mrb[5].mxu1 }
 0x30c   :  { %v594_v5 = vpop.f32.mrb[6].mxu1 }
 0x30d   :  { %v1271_v6 = vpop.f32.mrb[7].mxu1  ;;  %1289 = vmatmul.mubr.bf16.vlgmr.msra.gmra.mrb[8].mxu0 %v597_v3  ;;  %v390_v3 = vrot.slane %v1640_v41, %v389_v50  ;;  %v1002_v41 = vld [vmem:[%s1947_s4 + $0xa] sm:$0x1] }
 0x30e   :  { %1293 = vmatpush3.bf16.msra.mxu0 %v1426_v2  ;;  %1308 = vmatprep.mubr.msk.bf16.mxu0 %vm1483_vm2, %v1482_v58 }
 0x30f   :  { %1294 = vmatprep.subr.bf16.mxu0 %v1482_v58  ;;  %v473_v5 = vadd.f32 %v1833_v61, %v390_v3 }
 0x312   :  { %1295 = vmatpush3.bf16.msra.mxu0 %v1430_v7 }
 0x313   :  { %1296 = vmatprep.subr.bf16.mxu0 %v1482_v58 }
 0x316   :  { %1297 = vmatpush3.bf16.msra.mxu0 %v1434_v8 }
 0x317   :  { %1298 = vmatprep.subr.bf16.mxu0 %v1482_v58 }
 0x31a   :  { %1299 = vmatpush3.bf16.msra.mxu0 %v1438_v9 }
 0x31b   :  { %1300 = vmatprep.subr.bf16.mxu0 %v1482_v58 }
 0x31e   :  { %1301 = vmatpush3.bf16.msra.mxu0 %v1442_v10 }
 0x31f   :  { %1302 = vmatprep.subr.bf16.mxu0 %v1482_v58 }
 0x322   :  { %1303 = vmatpush3.bf16.msra.mxu0 %v1446_v11 }
 0x323   :  { %1304 = vmatprep.subr.bf16.mxu0 %v1482_v58 }
 0x326   :  { %1305 = vmatpush3.bf16.msra.mxu0 %v1450_v12 }
 0x327   :  { %1306 = vmatprep.subr.bf16.mxu0 %v1482_v58 }
 0x32a   :  { %1307 = vmatpush3.bf16.msra.mxu0 %v1454_v15 }
 0x3e0   :  { %v696_v19 = vpop.f32.mrb[8].mxu0 }
 0x3e1   :  { %v702_v20 = vadd.f32 %v696_v19, %v176_v18  ;;  %v1290_v21 = vpop.f32.mrb[9].mxu0 }
 0x3e2   :  { %v699_v22 = vpop.f32.mrb[10].mxu0 }
 0x3e3   :  { %v703_v23 = vmax.f32 %v702_v20, 0.0  ;;  %v1291_v24 = vpop.f32.mrb[11].mxu0 }
 0x3e5   :  { %v704_v25 = vpack.c.bf16 %v703_v23, %v703_v23 }
 0x3e7   :  { %915 = vmatmul.mubr.bf16.vlgmr.msra.gmra.mrb[8].mxu1 %v704_v25  ;;  %1309 = vmatmul.mubr.bf16.vlgmr.msra.gmra.mrb[12].mxu0 %v704_v25 }
 0x3e8   :  { %1328 = vmatprep.mubr.msk.bf16.mxu1 %vm1483_vm2, %v1482_v58  ;;  %1313 = vmatpush3.bf16.msra.mxu1 %v1455_v26 }
 0x3e9   :  { %1314 = vmatprep.subr.bf16.mxu1 %v1482_v58 }
 0x3ec   :  { %1315 = vmatpush3.bf16.msra.mxu1 %v1456_v40 }
 0x3ed   :  { %1316 = vmatprep.subr.bf16.mxu1 %v1482_v58 }
 0x3f0   :  { %1317 = vmatpush3.bf16.msra.mxu1 %v1457_v49 }
 0x3f1   :  { %1318 = vmatprep.subr.bf16.mxu1 %v1482_v58 }
 0x3f4   :  { %1319 = vmatpush3.bf16.msra.mxu1 %v1458_v27 }
 0x3f5   :  { %1320 = vmatprep.subr.bf16.mxu1 %v1482_v58 }
 0x3f8   :  { %1321 = vmatpush3.bf16.msra.mxu1 %v1459_v28 }
 0x3f9   :  { %1322 = vmatprep.subr.bf16.mxu1 %v1482_v58 }
 0x3fc   :  { %1323 = vmatpush3.bf16.msra.mxu1 %v1460_v29 }
 0x3fd   :  { %1324 = vmatprep.subr.bf16.mxu1 %v1482_v58 }
 0x400   :  { %1325 = vmatpush3.bf16.msra.mxu1 %v1461_v30 }
 0x401   :  { %1326 = vmatprep.subr.bf16.mxu1 %v1482_v58 }
 0x404   :  { %1327 = vmatpush3.bf16.msra.mxu1 %v1462_v31 }
 0x4ba   :  { %v916_v45 = vpop.f32.mrb[8].mxu1  ;;  %v957_v46 = vpop.f32.mrb[12].mxu0 }
 0x4bb   :  { %v917_v47 = vadd.f32 %v916_v45, %v870_v42  ;;  %v918_v58 = vpop.f32.mrb[9].mxu1  ;;  %v1310_v48 = vpop.f32.mrb[13].mxu0  ;;  %v958_v7 = vadd.f32 %v957_v46, %v878_v60 }
 0x4bc   :  { %v919_v52 = vadd.f32 %v918_v58, %v874_v37  ;;  %v920_v53 = vpop.f32.mrb[10].mxu1  ;;  %v960_v54 = vpop.f32.mrb[14].mxu0 }
 0x4bd   :  { %v963_v55 = vadd.f32 %v917_v47, %v432_v1  ;;  %v921_v56 = vpop.f32.mrb[11].mxu1  ;;  %v1311_v57 = vpop.f32.mrb[15].mxu0 }
 0x4be   :  { %v970_v59 = vadd.f32 %v919_v52, %v471_v51 }
 0x4bf   :  { %v1206_v39 = vmul.f32 -1.442695, %v963_v55 }
 0x4c0   :  { %v1207_v62 = vmul.f32 -1.442695, %v970_v59 }
 0x4c1   :  { %1467 = vpow2.f32 %v1206_v39 }
 0x4c2   :  { %1469 = vpow2.f32 %v1207_v62 }
 0x4cb   :  { %v1468_v63 = vpop.eup %1467 }
 0x4cc   :  { %v967_v0 = vadd.f32 1.0, %v1468_v63  ;;  %v1470_v2 = vpop.eup %1469 }
 0x4cd   :  { %v974_v4 = vadd.f32 1.0, %v1470_v2 }
 0x4ce   :  { %1471 = vrcp.f32 %v967_v0 }
 0x4cf   :  { %1473 = vrcp.f32 %v974_v4 }
 0x4d8   :  { %v1472_v6 = vpop.eup %1471 }
 0x4d9   :  { %v977_v8 = vmul.f32 %v1472_v6, %v473_v5  ;;  %v1474_v10 = vpop.eup %1473 }
 0x4da   :  { %v980_v11 = vsub.f32 1.0, %v1474_v10  ;;  %v982_v14 = vmul.f32 %v1474_v10, %v1615_v34 }
 0x4db   :  { %v978_v9 = vadd.f32 %v977_v8, %v958_v7 }
 0x4dd   :  { %1475 = vtanh.f32 %v978_v9 }
 0x4e7   :  { %v1476_v12 = vpop.eup %1475 }
 0x4e8   :  { %v981_v13 = vmul.f32 %v1476_v12, %v980_v11 }
 0x4ea   :  { %v983_v38 = vadd.f32 %v982_v14, %v981_v13 }
 0x4ec   :  { %984 = vst [vmem:[#allocation2] sm:$0x1] %v983_v38  ;;  %v985_v15 = vpack.c.bf16 %v983_v38, %v983_v38  ;;  %1112 = vst.msk [vmem:[%s1949_s5 + $0x1] sm:$0x1] %vm1774_vm3, %v983_v38 }
 0x4ee   :  { %1329 = vmatmul.mubr.bf16.vlgmr.msra.gmra.mrb[12].mxu1 %v985_v15 }
 0x5c1   :  { %v1085_v61 = vpop.f32.mrb[12].mxu1 }
 0x5c2   :  { %v1086_v16 = vadd.f32 %v1085_v61, %v1002_v41  ;;  %v1330_v17 = vpop.f32.mrb[13].mxu1 }
 0x5c3   :  { %v1088_v34 = vpop.f32.mrb[14].mxu1 }
 0x5c4   :  { %v1331_v18 = vpop.f32.mrb[15].mxu1  ;;  %v1092_v19 = vsel %vm1091_vm4, %v1086_v16, -inf }
 0x5c5   :  { %v1093_v20 = vsel %vm480_vm1, %v1092_v19, -inf }
 0x5c6   :  { %1094 = vmax.xlane.f32.xlu1 %v1093_v20 }
 0x653   :  { %v1095_v21 = vpop.xlane.xlu1 %1094 }
 0x654   :  { %v1096_v22 = vsub.f32 %v1092_v19, %v1095_v21 }
 0x656   :  { %v1097_v23 = vmul.f32 1.442695, %v1096_v22 }
 0x658   :  { %1477 = vpow2.f32 %v1097_v23 }
 0x662   :  { %v1478_v24 = vpop.eup %1477 }
 0x663   :  { %v1099_v25 = vsel %vm480_vm1, %v1478_v24, 0.0 }
 0x664   :  { %1100 = vadd.xlane.f32.xlu1 %v1099_v25 }
 0x6f1   :  { %v1101_v26 = vpop.xlane.xlu1 %1100 }
 0x6f2   :  { %1479 = vlog2.f32 %v1101_v26 }
 0x6fc   :  { %v1480_v40 = vpop.eup %1479 }
 0x6fd   :  { %v1103_v49 = vmul.f32 0.6931472, %v1480_v40 }
 0x6ff   :  { %v1104_v27 = vadd.f32 %v1103_v49, %v1095_v21 }
 0x701   :  { %v1105_v28 = vsub.f32 %v1092_v19, %v1104_v27 }
 0x703   :  { %v1106_v29 = vsel %vm1091_vm4, %v1105_v28, 0.0 }
 0x704   :  { %1111 = vst.msk [vmem:[%s1949_s5] sm:$0x1] %vm1774_vm3, %v1106_v29 }

</bundles_post_ra>
